<compile_context>
chip_gen: v5e
topology: v5e:2x2
jax: 0.10.0
libtpu: 0.0.40
codegen_flags: <defaults>
</compile_context>

<pallas_src>
import math
import functools

import jax
import jax.numpy as jnp
from jax.experimental import pallas as pl
from jax.experimental.pallas import tpu as pltpu

# ---------------- model hyper-parameters (small, deterministic) -------------
PARAMS = dict(
    model_dim=32,
    dim_k=8,
    dim_v=8,
    h=4,
    dim_ff=64,
    context_length=8,
    dropout=0.0,
)
LN_EPS = 1e-5  # torch.nn.LayerNorm default


# ------------------------------- kernel -------------------------------------
def block_kernel(x_ref, c_ref, w_ref, o_ref, *, B, T, D, H, DK, F):
    """x_ref: (B*T, D) f32, c_ref: f32 constants slab, w_ref: bf16 weights slab."""
    BHT = B * H * T
    HD = H * D
    QKVW = 2 * DK + D
    vec = 3 * BHT  # first row of the small-vector region (8-row spacing)

    x = x_ref[...].astype(jnp.float32)                       # (B*T, D)

    # ---- constant slabs (static slices; no iota/compare/where in-kernel) ----
    xmask = c_ref[0:BHT, 0:HD]                               # block-diag replication mask
    smask = c_ref[BHT:2 * BHT, 0:BHT]                        # additive causal/head mask
    bqkv = c_ref[2 * BHT:3 * BHT, 0:QKVW]                    # broadcast QKV bias
    ln1w = c_ref[vec + 0:vec + 1, 0:D]
    ln1b = c_ref[vec + 8:vec + 9, 0:D]
    ln2w = c_ref[vec + 16:vec + 17, 0:D]
    ln2b = c_ref[vec + 24:vec + 25, 0:D]
    b1 = c_ref[vec + 32:vec + 33, 0:F]
    b2 = c_ref[vec + 40:vec + 41, 0:D]
    wqkv = w_ref[0:HD, 0:QKVW]                               # bf16 (H*D, 2*DK+D)
    w1 = w_ref[HD:HD + D, 0:F]                               # bf16 (D, F)
    w2 = w_ref[HD + D:HD + D + F, 0:D]                       # bf16 (F, D)

    # ---- LayerNorm 1 (f32) ----
    mu = jnp.mean(x, axis=-1, keepdims=True)
    var = jnp.mean((x - mu) ** 2, axis=-1, keepdims=True)
    xn = (x - mu) * jax.lax.rsqrt(var + LN_EPS) * ln1w + ln1b

    # ---- fused QKV projection for all (batch, head) pairs: one MXU push ----
    # x_big[(b*H + h)*T + t, h*D + d] = xn[b*T + t, d]; zero elsewhere.
    x_rows = jnp.concatenate(
        [xn[b * T:(b + 1) * T] for b in range(B) for _ in range(H)], axis=0)  # (BHT, D)
    x_rep = jnp.concatenate([x_rows] * H, axis=1)                             # (BHT, H*D)
    x_big = (x_rep * xmask).astype(jnp.bfloat16)
    qkv = jnp.dot(x_big, wqkv, preferred_element_type=jnp.float32) + bqkv
    q = qkv[:, 0:DK]                    # 1/sqrt(DK) already folded into wqkv / bqkv
    k = qkv[:, DK:2 * DK]
    vw = qkv[:, 2 * DK:2 * DK + D]      # V @ W_O (W_O folded at pack time)

    # ---- attention: one score matmul / softmax / PV for all (batch, head) ----
    s = jax.lax.dot_general(q, k, (((1,), (1,)), ((), ())),
                            preferred_element_type=jnp.float32) + smask
    s = s - jnp.max(s, axis=-1, keepdims=True)      # diagonal is always unmasked
    p = jnp.exp(s)
    p = p * pl.reciprocal(jnp.sum(p, axis=-1, keepdims=True), approx=True)
    contrib = jnp.dot(p, vw, preferred_element_type=jnp.float32)              # (BHT, D)

    # ---- head reduction: vreg-aligned sublane-block adds ----
    parts = []
    for b in range(B):
        acc = contrib[(b * H) * T:(b * H + 1) * T]
        for h in range(1, H):
            acc = acc + contrib[(b * H + h) * T:(b * H + h + 1) * T]
        parts.append(acc)
    attn = jnp.concatenate(parts, axis=0)                                     # (B*T, D)

    x1 = x + attn                                                             # residual 1

    # ---- LayerNorm 2 (f32) ----
    mu2 = jnp.mean(x1, axis=-1, keepdims=True)
    var2 = jnp.mean((x1 - mu2) ** 2, axis=-1, keepdims=True)
    xn2 = (x1 - mu2) * jax.lax.rsqrt(var2 + LN_EPS) * ln2w + ln2b

    # ---- feed-forward (bf16 MXU operands, f32 accumulate / elementwise) ----
    h1 = jnp.dot(xn2.astype(jnp.bfloat16), w1,
                 preferred_element_type=jnp.float32) + b1
    h1 = jnp.maximum(h1, 0.0)                                                 # ReLU
    ff = jnp.dot(h1.astype(jnp.bfloat16), w2,
                 preferred_element_type=jnp.float32) + b2

    o_ref[...] = (x1 + ff).astype(o_ref.dtype)                                # residual 2


# -------------------------- host-side operand packing -----------------------
def _pack_operands(params, B, T):
    """Build the f32 constants slab and bf16 weights slab."""
    D, DK, DV, H, F = (PARAMS['model_dim'], PARAMS['dim_k'], PARAMS['dim_v'],
                       PARAMS['h'], PARAMS['dim_ff'])
    BHT, HD, QKVW = B * H * T, H * D, 2 * DK + D
    scale = 1.0 / math.sqrt(DK)

    # Per-head stacked QKV weight: [ Wq*scale | Wk | Wv @ Wo ]  -> (H*D, 2*DK+D)
    wq_h = params['wq'].reshape(D, H, DK).transpose(1, 0, 2) * scale          # (H, D, DK)
    wk_h = params['wk'].reshape(D, H, DK).transpose(1, 0, 2)                  # (H, D, DK)
    wv_h = params['wv'].reshape(D, H, DV).transpose(1, 0, 2)                  # (H, D, DV)
    wo_h = params['wo'].reshape(H, DV, D)                                     # (H, DV, D)
    wvo_h = jnp.einsum('hdv,hvm->hdm', wv_h, wo_h)                            # (H, D, D)
    w_qkv = jnp.concatenate([wq_h, wk_h, wvo_h], axis=-1).reshape(HD, QKVW)

    bq_h = params['bq'].reshape(H, DK) * scale
    bk_h = params['bk'].reshape(H, DK)
    bvo_h = jnp.einsum('hv,hvm->hm', params['bv'].reshape(H, DV), wo_h)       # (H, D)
    b_h = jnp.concatenate([bq_h, bk_h, bvo_h], axis=-1)                       # (H, QKVW)
    b_qkv = jnp.broadcast_to(b_h[None, :, None, :],
                             (B, H, T, QKVW)).reshape(BHT, QKVW)

    # Precomputed masks.
    r = jnp.arange(BHT)
    col = jnp.arange(HD)
    xmask = (((r[:, None] // T) % H) == (col[None, :] // D)).astype(jnp.float32)
    same = (r[:, None] // T) == (r[None, :] // T)          # same (batch, head) block
    causal = (r[:, None] % T) >= (r[None, :] % T)
    smask = jnp.where(same & causal, 0.0, -1e30).astype(jnp.float32)

    # f32 constants slab (one DMA).
    LANES = 128
    assert max(HD, BHT, QKVW, F, D) <= LANES
    vec = 3 * BHT
    crows = vec + 48                                        # 6 vectors, 8-row spacing
    consts = jnp.zeros((crows, LANES), jnp.float32)
    consts = consts.at[0:BHT, 0:HD].set(xmask)
    consts = consts.at[BHT:2 * BHT, 0:BHT].set(smask)
    consts = consts.at[2 * BHT:3 * BHT, 0:QKVW].set(b_qkv)
    consts = consts.at[vec + 0, 0:D].set(params['ln1_w'])
    consts = consts.at[vec + 8, 0:D].set(params['ln1_b'])
    consts = consts.at[vec + 16, 0:D].set(params['ln2_w'])
    consts = consts.at[vec + 24, 0:D].set(params['ln2_b'])
    consts = consts.at[vec + 32, 0:F].set(params['b1'])
    consts = consts.at[vec + 40, 0:D].set(params['b2'])

    # bf16 weights slab (one DMA, native MXU input dtype).
    WLANES = 64
    assert max(QKVW, F, D) <= WLANES
    wrows = HD + D + F
    wslab = jnp.zeros((wrows, WLANES), jnp.bfloat16)
    wslab = wslab.at[0:HD, 0:QKVW].set(w_qkv.astype(jnp.bfloat16))
    wslab = wslab.at[HD:HD + D, 0:F].set(params['w1'].astype(jnp.bfloat16))
    wslab = wslab.at[HD + D:HD + D + F, 0:D].set(params['w2'].astype(jnp.bfloat16))
    return consts, wslab


# ------------------------------ wrapper -------------------------------------
def block_forward(x, params):
    """x: (B, T, D) float32. params: dict of natural-layout weights."""
    B, T, D = x.shape
    H, DK, F = PARAMS['h'], PARAMS['dim_k'], PARAMS['dim_ff']

    consts, wslab = _pack_operands(params, B, T)
    kernel = functools.partial(block_kernel, B=B, T=T, D=D, H=H, DK=DK, F=F)

    vmem = pl.BlockSpec(memory_space=pltpu.MemorySpace.VMEM)
    out2d = pl.pallas_call(
        kernel,
        out_shape=jax.ShapeDtypeStruct((B * T, D), x.dtype),
        in_specs=[vmem, vmem, vmem],
        out_specs=pl.BlockSpec(memory_space=pltpu.MemorySpace.VMEM),
    )(x.reshape(B * T, D), consts, wslab)
    return out2d.reshape(B, T, D)


# ----------------------- deterministic parameter init -----------------------
def init_params(key):
    D, DK, DV, H, F = (PARAMS['model_dim'], PARAMS['dim_k'], PARAMS['dim_v'],
                       PARAMS['h'], PARAMS['dim_ff'])
    keys = jax.random.split(key, 6)

    def linear(k, fan_in, fan_out):
        # torch.nn.Linear default: U(-1/sqrt(fan_in), 1/sqrt(fan_in)).
        kw, kb = jax.random.split(k)
        bound = 1.0 / math.sqrt(fan_in)
        w = jax.random.uniform(kw, (fan_in, fan_out), jnp.float32, -bound, bound)
        b = jax.random.uniform(kb, (fan_out,), jnp.float32, -bound, bound)
        return w, b

    wq, bq = linear(keys[0], D, H * DK)   # columns h*DK:(h+1)*DK = head h
    wk, bk = linear(keys[1], D, H * DK)
    wv, bv = linear(keys[2], D, H * DV)
    wo, _ = linear(keys[3], H * DV, D)    # torch W_O: bias=False
    w1, b1 = linear(keys[4], D, F)
    w2, b2 = linear(keys[5], F, D)

    return dict(
        ln1_w=jnp.ones((D,), jnp.float32), ln1_b=jnp.zeros((D,), jnp.float32),
        ln2_w=jnp.ones((D,), jnp.float32), ln2_b=jnp.zeros((D,), jnp.float32),
        wq=wq, bq=bq, wk=wk, bk=bk, wv=wv, bv=bv, wo=wo,
        w1=w1, b1=b1, w2=w2, b2=b2,
    )


# --------------------------- pure-JAX reference ------------------------------
def block_reference(x, params):
    DK, DV, H = PARAMS['dim_k'], PARAMS['dim_v'], PARAMS['h']

    def ln(v, w, b):
        mu = jnp.mean(v, axis=-1, keepdims=True)
        var = jnp.mean((v - mu) ** 2, axis=-1, keepdims=True)
        return (v - mu) / jnp.sqrt(var + LN_EPS) * w + b

    T = x.shape[1]
    xn = ln(x, params['ln1_w'], params['ln1_b'])
    q = xn @ params['wq'] + params['bq']
    k = xn @ params['wk'] + params['bk']
    v = xn @ params['wv'] + params['bv']
    tril = jnp.tril(jnp.ones((T, T), bool))
    heads = []
    for h in range(H):
        qh = q[..., h * DK:(h + 1) * DK]
        kh = k[..., h * DK:(h + 1) * DK]
        vh = v[..., h * DV:(h + 1) * DV]
        s = qh @ jnp.swapaxes(kh, -1, -2) / math.sqrt(DK)
        s = jnp.where(tril, s, -jnp.inf)
        heads.append(jax.nn.softmax(s, axis=-1) @ vh)
    x1 = x + jnp.concatenate(heads, axis=-1) @ params['wo']
    xn2 = ln(x1, params['ln2_w'], params['ln2_b'])
    ff = jnp.maximum(xn2 @ params['w1'] + params['b1'], 0.0) @ params['w2'] + params['b2']
    return x1 + ff


if __name__ == "__main__":
    key = jax.random.PRNGKey(0)
    pkey, xkey = jax.random.split(key)
    params = init_params(pkey)

    B, T, D = 2, PARAMS['context_length'], PARAMS['model_dim']
    x = jax.random.normal(xkey, (B, T, D), jnp.float32)

    out = block_forward(x, params)
    jax.block_until_ready(out)
    assert out.shape == (B, T, D)

    ref = block_reference(x, params)
    err = float(jnp.max(jnp.abs(out - ref)))
    # bf16 matmul operands (per perf guidance, f32 accumulation) plus the
    # approximate softmax reciprocal give ~1e-2-scale worst-case deviation.
    assert err < 2e-2, f"max abs error vs reference: {err}"
    print("KERNEL_OK")
</pallas_src>

<mosaic_0001>
module attributes {stable_mosaic.version = 11 : i64} {
  func.func @block_kernel(%arg0: memref<16x32xf32, #tpu.memory_space<vmem>>, %arg1: memref<240x128xf32, #tpu.memory_space<vmem>>, %arg2: memref<224x64xbf16, #tpu.memory_space<vmem>>, %arg3: memref<16x32xf32, #tpu.memory_space<vmem>>) attributes {dimension_semantics = [], scalar_prefetch = 0 : i64, scratch_operands = 0 : i64, tpu.core_type = #tpu.core_type<tc>} {
    %c0 = arith.constant 0 : index
    %c0_0 = arith.constant 0 : index
    %0 = vector.load %arg0[%c0, %c0_0] : memref<16x32xf32, #tpu.memory_space<vmem>>, vector<16x32xf32>
    %c0_1 = arith.constant 0 : index
    %c0_2 = arith.constant 0 : index
    %1 = vector.load %arg1[%c0_1, %c0_2] : memref<240x128xf32, #tpu.memory_space<vmem>>, vector<64x128xf32>
    %c64 = arith.constant 64 : index
    %c0_3 = arith.constant 0 : index
    %2 = vector.load %arg1[%c64, %c0_3] : memref<240x128xf32, #tpu.memory_space<vmem>>, vector<64x64xf32>
    %c128 = arith.constant 128 : index
    %c0_4 = arith.constant 0 : index
    %3 = vector.load %arg1[%c128, %c0_4] : memref<240x128xf32, #tpu.memory_space<vmem>>, vector<64x48xf32>
    %c192 = arith.constant 192 : index
    %c0_5 = arith.constant 0 : index
    %4 = vector.load %arg1[%c192, %c0_5] : memref<240x128xf32, #tpu.memory_space<vmem>>, vector<1x32xf32>
    %c200 = arith.constant 200 : index
    %c0_6 = arith.constant 0 : index
    %5 = vector.load %arg1[%c200, %c0_6] : memref<240x128xf32, #tpu.memory_space<vmem>>, vector<1x32xf32>
    %c208 = arith.constant 208 : index
    %c0_7 = arith.constant 0 : index
    %6 = vector.load %arg1[%c208, %c0_7] : memref<240x128xf32, #tpu.memory_space<vmem>>, vector<1x32xf32>
    %c216 = arith.constant 216 : index
    %c0_8 = arith.constant 0 : index
    %7 = vector.load %arg1[%c216, %c0_8] : memref<240x128xf32, #tpu.memory_space<vmem>>, vector<1x32xf32>
    %c224 = arith.constant 224 : index
    %c0_9 = arith.constant 0 : index
    %8 = vector.load %arg1[%c224, %c0_9] : memref<240x128xf32, #tpu.memory_space<vmem>>, vector<1x64xf32>
    %c232 = arith.constant 232 : index
    %c0_10 = arith.constant 0 : index
    %9 = vector.load %arg1[%c232, %c0_10] : memref<240x128xf32, #tpu.memory_space<vmem>>, vector<1x32xf32>
    %c0_11 = arith.constant 0 : index
    %c0_12 = arith.constant 0 : index
    %10 = vector.load %arg2[%c0_11, %c0_12] : memref<224x64xbf16, #tpu.memory_space<vmem>>, vector<128x48xbf16>
    %c128_13 = arith.constant 128 : index
    %c0_14 = arith.constant 0 : index
    %11 = vector.load %arg2[%c128_13, %c0_14] : memref<224x64xbf16, #tpu.memory_space<vmem>>, vector<32x64xbf16>
    %c160 = arith.constant 160 : index
    %c0_15 = arith.constant 0 : index
    %12 = vector.load %arg2[%c160, %c0_15] : memref<224x64xbf16, #tpu.memory_space<vmem>>, vector<64x32xbf16>
    %cst = arith.constant dense<0.000000e+00> : vector<16xf32>
    %13 = vector.multi_reduction <add>, %0, %cst [1] : vector<16x32xf32> to vector<16xf32>
    %14 = vector.shape_cast %13 : vector<16xf32> to vector<16x1xf32>
    %cst_16 = arith.constant 3.200000e+01 : f32
    %15 = vector.broadcast %cst_16 : f32 to vector<16x1xf32>
    %16 = arith.divf %14, %15 : vector<16x1xf32>
    %17 = vector.broadcast %16 : vector<16x1xf32> to vector<16x32xf32>
    %18 = arith.subf %0, %17 : vector<16x32xf32>
    %19 = arith.mulf %18, %18 : vector<16x32xf32>
    %cst_17 = arith.constant dense<0.000000e+00> : vector<16xf32>
    %20 = vector.multi_reduction <add>, %19, %cst_17 [1] : vector<16x32xf32> to vector<16xf32>
    %21 = vector.shape_cast %20 : vector<16xf32> to vector<16x1xf32>
    %cst_18 = arith.constant 3.200000e+01 : f32
    %22 = vector.broadcast %cst_18 : f32 to vector<16x1xf32>
    %23 = arith.divf %21, %22 : vector<16x1xf32>
    %24 = vector.broadcast %16 : vector<16x1xf32> to vector<16x32xf32>
    %25 = arith.subf %0, %24 : vector<16x32xf32>
    %cst_19 = arith.constant 9.99999974E-6 : f32
    %26 = vector.broadcast %cst_19 : f32 to vector<16x1xf32>
    %27 = arith.addf %23, %26 : vector<16x1xf32>
    %28 = math.rsqrt %27 : vector<16x1xf32>
    %29 = vector.broadcast %28 : vector<16x1xf32> to vector<16x32xf32>
    %30 = arith.mulf %25, %29 : vector<16x32xf32>
    %31 = vector.broadcast %4 : vector<1x32xf32> to vector<16x32xf32>
    %32 = arith.mulf %30, %31 : vector<16x32xf32>
    %33 = vector.broadcast %5 : vector<1x32xf32> to vector<16x32xf32>
    %34 = arith.addf %32, %33 : vector<16x32xf32>
    %35 = vector.extract_strided_slice %34 {offsets = [0, 0], sizes = [8, 32], strides = [1, 1]} : vector<16x32xf32> to vector<8x32xf32>
    %36 = vector.extract_strided_slice %34 {offsets = [0, 0], sizes = [8, 32], strides = [1, 1]} : vector<16x32xf32> to vector<8x32xf32>
    %37 = vector.extract_strided_slice %34 {offsets = [0, 0], sizes = [8, 32], strides = [1, 1]} : vector<16x32xf32> to vector<8x32xf32>
    %38 = vector.extract_strided_slice %34 {offsets = [0, 0], sizes = [8, 32], strides = [1, 1]} : vector<16x32xf32> to vector<8x32xf32>
    %39 = vector.extract_strided_slice %34 {offsets = [8, 0], sizes = [8, 32], strides = [1, 1]} : vector<16x32xf32> to vector<8x32xf32>
    %40 = vector.extract_strided_slice %34 {offsets = [8, 0], sizes = [8, 32], strides = [1, 1]} : vector<16x32xf32> to vector<8x32xf32>
    %41 = vector.extract_strided_slice %34 {offsets = [8, 0], sizes = [8, 32], strides = [1, 1]} : vector<16x32xf32> to vector<8x32xf32>
    %42 = vector.extract_strided_slice %34 {offsets = [8, 0], sizes = [8, 32], strides = [1, 1]} : vector<16x32xf32> to vector<8x32xf32>
    %43 = tpu.concatenate %35, %36, %37, %38, %39, %40, %41, %42 in 0 : vector<8x32xf32>, vector<8x32xf32>, vector<8x32xf32>, vector<8x32xf32>, vector<8x32xf32>, vector<8x32xf32>, vector<8x32xf32>, vector<8x32xf32> -> vector<64x32xf32>
    %44 = tpu.concatenate %43, %43, %43, %43 in 1 : vector<64x32xf32>, vector<64x32xf32>, vector<64x32xf32>, vector<64x32xf32> -> vector<64x128xf32>
    %45 = arith.mulf %44, %1 : vector<64x128xf32>
    %46 = arith.truncf %45 : vector<64x128xf32> to vector<64x128xbf16>
    %cst_20 = arith.constant dense<0.000000e+00> : vector<64x48xf32>
    %47 = tpu.matmul %46, %10, %cst_20 {dimension_numbers = #tpu.dot_dimension_numbers<[1], [0], [0], [1], [0, 0, 1, 1], [], []>} : vector<64x128xbf16>, vector<128x48xbf16>, vector<64x48xf32> -> vector<64x48xf32>
    %48 = arith.addf %47, %3 : vector<64x48xf32>
    %49 = vector.extract_strided_slice %48 {offsets = [0, 0], sizes = [64, 8], strides = [1, 1]} : vector<64x48xf32> to vector<64x8xf32>
    %50 = vector.extract_strided_slice %48 {offsets = [0, 8], sizes = [64, 8], strides = [1, 1]} : vector<64x48xf32> to vector<64x8xf32>
    %51 = vector.extract_strided_slice %48 {offsets = [0, 16], sizes = [64, 32], strides = [1, 1]} : vector<64x48xf32> to vector<64x32xf32>
    %cst_21 = arith.constant dense<0.000000e+00> : vector<64x64xf32>
    %52 = tpu.matmul %49, %50, %cst_21 {dimension_numbers = #tpu.dot_dimension_numbers<[1], [1], [0], [0], [0, 0, 1, 0], [], []>} : vector<64x8xf32>, vector<64x8xf32>, vector<64x64xf32> -> vector<64x64xf32>
    %53 = arith.addf %52, %2 : vector<64x64xf32>
    %cst_22 = arith.constant dense<0xFF800000> : vector<64xf32>
    %54 = vector.multi_reduction <maximumf>, %53, %cst_22 [1] : vector<64x64xf32> to vector<64xf32>
    %55 = vector.shape_cast %54 : vector<64xf32> to vector<64x1xf32>
    %56 = vector.broadcast %55 : vector<64x1xf32> to vector<64x64xf32>
    %57 = arith.subf %53, %56 : vector<64x64xf32>
    %58 = math.exp %57 : vector<64x64xf32>
    %cst_23 = arith.constant dense<0.000000e+00> : vector<64xf32>
    %59 = vector.multi_reduction <add>, %58, %cst_23 [1] : vector<64x64xf32> to vector<64xf32>
    %60 = vector.shape_cast %59 : vector<64xf32> to vector<64x1xf32>
    %61 = tpu.reciprocal %60 {approx = true} : vector<64x1xf32> -> vector<64x1xf32>
    %62 = vector.broadcast %61 : vector<64x1xf32> to vector<64x64xf32>
    %63 = arith.mulf %58, %62 : vector<64x64xf32>
    %cst_24 = arith.constant dense<0.000000e+00> : vector<64x32xf32>
    %64 = tpu.matmul %63, %51, %cst_24 {dimension_numbers = #tpu.dot_dimension_numbers<[1], [0], [0], [1], [0, 0, 1, 1], [], []>} : vector<64x64xf32>, vector<64x32xf32>, vector<64x32xf32> -> vector<64x32xf32>
    %65 = vector.extract_strided_slice %64 {offsets = [0, 0], sizes = [8, 32], strides = [1, 1]} : vector<64x32xf32> to vector<8x32xf32>
    %66 = vector.extract_strided_slice %64 {offsets = [8, 0], sizes = [8, 32], strides = [1, 1]} : vector<64x32xf32> to vector<8x32xf32>
    %67 = arith.addf %65, %66 : vector<8x32xf32>
    %68 = vector.extract_strided_slice %64 {offsets = [16, 0], sizes = [8, 32], strides = [1, 1]} : vector<64x32xf32> to vector<8x32xf32>
    %69 = arith.addf %67, %68 : vector<8x32xf32>
    %70 = vector.extract_strided_slice %64 {offsets = [24, 0], sizes = [8, 32], strides = [1, 1]} : vector<64x32xf32> to vector<8x32xf32>
    %71 = arith.addf %69, %70 : vector<8x32xf32>
    %72 = vector.extract_strided_slice %64 {offsets = [32, 0], sizes = [8, 32], strides = [1, 1]} : vector<64x32xf32> to vector<8x32xf32>
    %73 = vector.extract_strided_slice %64 {offsets = [40, 0], sizes = [8, 32], strides = [1, 1]} : vector<64x32xf32> to vector<8x32xf32>
    %74 = arith.addf %72, %73 : vector<8x32xf32>
    %75 = vector.extract_strided_slice %64 {offsets = [48, 0], sizes = [8, 32], strides = [1, 1]} : vector<64x32xf32> to vector<8x32xf32>
    %76 = arith.addf %74, %75 : vector<8x32xf32>
    %77 = vector.extract_strided_slice %64 {offsets = [56, 0], sizes = [8, 32], strides = [1, 1]} : vector<64x32xf32> to vector<8x32xf32>
    %78 = arith.addf %76, %77 : vector<8x32xf32>
    %79 = tpu.concatenate %71, %78 in 0 : vector<8x32xf32>, vector<8x32xf32> -> vector<16x32xf32>
    %80 = arith.addf %0, %79 : vector<16x32xf32>
    %cst_25 = arith.constant dense<0.000000e+00> : vector<16xf32>
    %81 = vector.multi_reduction <add>, %80, %cst_25 [1] : vector<16x32xf32> to vector<16xf32>
    %82 = vector.shape_cast %81 : vector<16xf32> to vector<16x1xf32>
    %cst_26 = arith.constant 3.200000e+01 : f32
    %83 = vector.broadcast %cst_26 : f32 to vector<16x1xf32>
    %84 = arith.divf %82, %83 : vector<16x1xf32>
    %85 = vector.broadcast %84 : vector<16x1xf32> to vector<16x32xf32>
    %86 = arith.subf %80, %85 : vector<16x32xf32>
    %87 = arith.mulf %86, %86 : vector<16x32xf32>
    %cst_27 = arith.constant dense<0.000000e+00> : vector<16xf32>
    %88 = vector.multi_reduction <add>, %87, %cst_27 [1] : vector<16x32xf32> to vector<16xf32>
    %89 = vector.shape_cast %88 : vector<16xf32> to vector<16x1xf32>
    %cst_28 = arith.constant 3.200000e+01 : f32
    %90 = vector.broadcast %cst_28 : f32 to vector<16x1xf32>
    %91 = arith.divf %89, %90 : vector<16x1xf32>
    %92 = vector.broadcast %84 : vector<16x1xf32> to vector<16x32xf32>
    %93 = arith.subf %80, %92 : vector<16x32xf32>
    %cst_29 = arith.constant 9.99999974E-6 : f32
    %94 = vector.broadcast %cst_29 : f32 to vector<16x1xf32>
    %95 = arith.addf %91, %94 : vector<16x1xf32>
    %96 = math.rsqrt %95 : vector<16x1xf32>
    %97 = vector.broadcast %96 : vector<16x1xf32> to vector<16x32xf32>
    %98 = arith.mulf %93, %97 : vector<16x32xf32>
    %99 = vector.broadcast %6 : vector<1x32xf32> to vector<16x32xf32>
    %100 = arith.mulf %98, %99 : vector<16x32xf32>
    %101 = vector.broadcast %7 : vector<1x32xf32> to vector<16x32xf32>
    %102 = arith.addf %100, %101 : vector<16x32xf32>
    %103 = arith.truncf %102 : vector<16x32xf32> to vector<16x32xbf16>
    %cst_30 = arith.constant dense<0.000000e+00> : vector<16x64xf32>
    %104 = tpu.matmul %103, %11, %cst_30 {dimension_numbers = #tpu.dot_dimension_numbers<[1], [0], [0], [1], [0, 0, 1, 1], [], []>} : vector<16x32xbf16>, vector<32x64xbf16>, vector<16x64xf32> -> vector<16x64xf32>
    %105 = vector.broadcast %8 : vector<1x64xf32> to vector<16x64xf32>
    %106 = arith.addf %104, %105 : vector<16x64xf32>
    %cst_31 = arith.constant 0.000000e+00 : f32
    %107 = vector.broadcast %cst_31 : f32 to vector<16x64xf32>
    %108 = arith.maximumf %106, %107 : vector<16x64xf32>
    %109 = arith.truncf %108 : vector<16x64xf32> to vector<16x64xbf16>
    %cst_32 = arith.constant dense<0.000000e+00> : vector<16x32xf32>
    %110 = tpu.matmul %109, %12, %cst_32 {dimension_numbers = #tpu.dot_dimension_numbers<[1], [0], [0], [1], [0, 0, 1, 1], [], []>} : vector<16x64xbf16>, vector<64x32xbf16>, vector<16x32xf32> -> vector<16x32xf32>
    %111 = vector.broadcast %9 : vector<1x32xf32> to vector<16x32xf32>
    %112 = arith.addf %110, %111 : vector<16x32xf32>
    %113 = arith.addf %80, %112 : vector<16x32xf32>
    %c0_33 = arith.constant 0 : index
    %c0_34 = arith.constant 0 : index
    %114 = vector.load %arg3[%c0_33, %c0_34] : memref<16x32xf32, #tpu.memory_space<vmem>>, vector<16x32xf32>
    tpu.vector_store %arg3[%c0_33, %c0_34], %113 {strides = array<i32>} : memref<16x32xf32, #tpu.memory_space<vmem>>, vector<16x32xf32>,
    return
  }
}

</mosaic_0001>

<bundles_post_ra>
// kernel: tpu_custom_call.1
= control target key start
LH: loop header
LB: loop body
LE: loop exit
PB: predicated region body
PF: predicated region fallthrough
CT: control target
= control target key end

     0   :  { %8 = vsyncpa [#allocation3], 0  ;;  %s1174_s0 = inlined_call_operand.vmem [shape: f32[16,32], index: 0, kind: input, shape index: {}]   ;;  %s1175_s1 = inlined_call_operand.hbm [shape: f32[240,128], index: 1, kind: input, shape index: {}]   ;;  %s1176_s2 = inlined_call_operand.vmem [shape: bf16[224,64], index: 2, kind: input, shape index: {}]   ;;  %s1177_s3 = inlined_call_operand.hbm [shape: f32[16,32], index: 3, kind: output, shape index: {}]  }
   0x1   :  { %9 = vsyncpa [#allocation4], 0  ;;  %s16_s14 = sshll.u32 %s1175_s1, 4  ;;  %s925_s15 = smov [#allocation2]   ;;  %s17_s14 = int_to_ptr.hbm [resolvable:$true] %s16_s14 }
   0x2   :  { %s18_s16 = sshll.u32 %s925_s15, 4  ;;  %s926_s17 = smov 128   ;;  %s19_s16 = int_to_ptr.vmem [resolvable:$true] %s18_s16 }
   0x3   :  { %s927_s18 = smov 8  }
   0x4   :  { %24 = dma.hbm_to_vmem [thread:$0]  %s17_s14, 3840, %s19_s16, [#allocation3], %s926_s17, %s926_s17, %s927_s18  }
   0x5   :  { %921 = dma.done.wait [#allocation3], 3840  }
   0x6   :  { %922 = vsyncadd [#allocation3], 4294963456  ;;  %vm92_vm0 = vcmask 261120   ;;  %v964_v0 = vld [vmem:[%s1174_s0] sm:$0xff]  ;;  %v971_v2 = vld [vmem:[%s1174_s0 + $0x8] sm:$0xff]  ;;  %v928_v4 = vmov 32.0  }
   0x7   :  { %v93_v1 = vsel %vm92_vm0, %v964_v0, 0.0  ;;  %v96_v3 = vsel %vm92_vm0, %v971_v2, 0.0  ;;  %831 = vrcp.f32 %v928_v4  ;;  %v825_v35 = vld [vmem:[#allocation2 + $0xc0] ss:$0 sm:$0xff]  ;;  %v788_v36 = vld [vmem:[%s1176_s2 + $0x38] sm:$0xff]  ;;  %s929_s23 = smov 96  }
   0x8   :  { %94 = vadd.xlane.f32.xlu0 %v93_v1  ;;  %v826_v40 = vld [vmem:[#allocation2 + $0xc8] ss:$0 sm:$0xff]  ;;  %238 = vmatpush.bf16.msra.mxu0 %v788_v36  ;;  %s930_s24 = smov 32   ;;  %s931_s25 = smov 64   ;;  %v787_v50 = vld [vmem:[%s1176_s2 + $0x30] sm:$0xff]  ;;  %v785_v52 = vld [vmem:[%s1176_s2 + $0x20] sm:$0xff] }
   0x9   :  { %v786_v51 = vld [vmem:[%s1176_s2 + $0x28] sm:$0xff]  ;;  %v784_v53 = vld [vmem:[%s1176_s2 + $0x18] sm:$0xff]  ;;  %v783_v54 = vld [vmem:[%s1176_s2 + $0x10] sm:$0xff]  ;;  %vm172_vm8 = vcmask 523264   ;;  %vm175_vm9 = vcmask 785408   ;;  %s932_s13 = smov 120  }
   0xa   :  { %v782_v55 = vld [vmem:[%s1176_s2 + $0x8] sm:$0xff]  ;;  %v781_v56 = vld [vmem:[%s1176_s2] sm:$0xff]  ;;  %vm291_vm10 = vcmask 64512   ;;  %s933_s14 = smov 112   ;;  %s686_s30 = sshll.u32 %s1177_s3, 4  ;;  %s687_s30 = int_to_ptr.hbm [resolvable:$true] %s686_s30 }
   0xb   :  { %v34_v60 = vld [vmem:[#allocation2] sm:$0xff]  ;;  %v35_v61 = vld [vmem:[#allocation2 + $0x8] sm:$0xff] }
   0xc   :  { %239 = vmatpush.bf16.msra.mxu0 %v787_v50  ;;  %v52_v50 = vld [vmem:[#allocation2 + $0x90] sm:$0xff] }
   0xd   :  { %v832_v5 = vpop.eup %831 }
   0xe   :  { %v100_v6 = vmul.f32 32.0, %v832_v5  ;;  %vm104_vm1 = vweird.f32 %v832_v5 }
  0x10   :  { %97 = vadd.xlane.f32.xlu0 %v96_v3  ;;  %v101_v7 = vsub.f32 1.0, %v100_v6  ;;  %240 = vmatpush.bf16.msra.mxu0 %v786_v51  ;;  %v36_v6 = vld [vmem:[#allocation2 + $0x10] sm:$0xff] }
  0x12   :  { %v102_v8 = vmul.f32 %v832_v5, %v101_v7  ;;  %v37_v7 = vld [vmem:[#allocation2 + $0x18] sm:$0xff] }
  0x14   :  { %v103_v9 = vadd.f32 %v832_v5, %v102_v8  ;;  %241 = vmatpush.bf16.msra.mxu0 %v785_v52 }
  0x16   :  { %v975_v10 = vsel %vm104_vm1, %v832_v5, %v103_v9 }
  0x18   :  { %242 = vmatpush.bf16.msra.mxu0 %v784_v53 }
  0x1c   :  { %243 = vmatpush.bf16.msra.mxu0 %v783_v54 }
  0x20   :  { %244 = vmatpush.bf16.msra.mxu0 %v782_v55 }
  0x24   :  { %245 = vmatpush.bf16.msra.mxu0 %v781_v56 }
  0x7b   :  { %v95_v11 = vpop.xlane.xlu0 %94 }
  0x7c   :  { %v106_v12 = vmul.f32 %v975_v10, %v95_v11 }
  0x7e   :  { %v108_v13 = vsub.f32 %v964_v0, %v106_v12 }
  0x80   :  { %v110_v14 = vmul.f32 %v108_v13, %v108_v13 }
  0x82   :  { %v112_v15 = vsel %vm92_vm0, %v110_v14, 0.0 }
  0x83   :  { %113 = vadd.xlane.f32.xlu1 %v112_v15  ;;  %v98_v16 = vpop.xlane.xlu0 %97 }
  0x84   :  { %v107_v17 = vmul.f32 %v975_v10, %v98_v16 }
  0x86   :  { %v109_v18 = vsub.f32 %v971_v2, %v107_v17 }
  0x88   :  { %v111_v19 = vmul.f32 %v109_v18, %v109_v18 }
  0x8a   :  { %v115_v20 = vsel %vm92_vm0, %v111_v19, 0.0  ;;  %v39_v19 = vld [vmem:[#allocation2 + $0x28] sm:$0xff] }
  0x8b   :  { %116 = vadd.xlane.f32.xlu1 %v115_v20 }
  0xf6   :  { %v114_v21 = vpop.xlane.xlu1 %113 }
  0xf7   :  { %v118_v22 = vmul.f32 %v114_v21, %v975_v10 }
  0xf9   :  { %v120_v23 = vadd.f32 1e-05, %v118_v22 }
  0xfb   :  { %833 = vrsqrt.f32 %v120_v23  ;;  %vm128_vm3 = vweird.f32 %v120_v23 }
  0xfe   :  { %v117_v24 = vpop.xlane.xlu1 %116 }
  0xff   :  { %v119_v25 = vmul.f32 %v117_v24, %v975_v10  ;;  %v41_v24 = vld [vmem:[#allocation2 + $0x38] sm:$0xff] }
 0x101   :  { %v834_v26 = vpop.eup %833  ;;  %v121_v27 = vadd.f32 1e-05, %v119_v25 }
 0x102   :  { %v123_v28 = vmul.f32 %v834_v26, %v120_v23  ;;  %vm129_vm2 = vweird.f32 %v834_v26  ;;  %v40_v23 = vld [vmem:[#allocation2 + $0x30] sm:$0xff] }
 0x103   :  { %835 = vrsqrt.f32 %v121_v27  ;;  %vm130_vm4 = vmor %vm128_vm3, %vm129_vm2  ;;  %vm138_vm5 = vweird.f32 %v121_v27 }
 0x104   :  { %v124_v29 = vmul.f32 %v834_v26, %v123_v28 }
 0x106   :  { %v125_v30 = vmul.f32 0.5, %v124_v29 }
 0x108   :  { %v126_v31 = vsub.f32 1.5, %v125_v30 }
 0x109   :  { %v836_v32 = vpop.eup %835 }
 0x10a   :  { %v127_v33 = vmul.f32 %v834_v26, %v126_v31  ;;  %v133_v34 = vmul.f32 %v836_v32, %v121_v27  ;;  %vm139_vm6 = vweird.f32 %v836_v32 }
 0x10b   :  { %vm140_vm7 = vmor %vm138_vm5, %vm139_vm6 }
 0x10c   :  { %v131_v37 = vsel %vm130_vm4, %v834_v26, %v127_v33  ;;  %v134_v38 = vmul.f32 %v836_v32, %v133_v34 }
 0x10d   :  { %v142_v39 = vmul.f32 %v131_v37, %v108_v13 }
 0x10e   :  { %v135_v41 = vmul.f32 0.5, %v134_v38  ;;  %v56_v38 = vld [vmem:[#allocation2 + $0xb0] sm:$0xff] }
 0x10f   :  { %v145_v42 = vmul.f32 %v825_v35, %v142_v39 }
 0x110   :  { %v136_v43 = vsub.f32 1.5, %v135_v41  ;;  %v53_v41 = vld [vmem:[#allocation2 + $0x98] sm:$0xff] }
 0x111   :  { %v148_v44 = vadd.f32 %v826_v40, %v145_v42  ;;  %v57_v42 = vld [vmem:[#allocation2 + $0xb8] sm:$0xff] }
 0x112   :  { %v137_v45 = vmul.f32 %v836_v32, %v136_v43 }
 0x113   :  { %164 = vrot.lane.b32.xlu0 %v148_v44, %s929_s23  ;;  %152 = vrot.lane.b32.xlu2 %v148_v44, %s930_s24 }
 0x114   :  { %v141_v46 = vsel %vm140_vm7, %v836_v32, %v137_v45  ;;  %v54_v32 = vld [vmem:[#allocation2 + $0xa0] sm:$0xff] }
 0x115   :  { %v143_v47 = vmul.f32 %v141_v46, %v109_v18  ;;  %v38_v18 = vld [vmem:[#allocation2 + $0x20] sm:$0xff] }
 0x116   :  { %v50_v46 = vld [vmem:[#allocation2 + $0x80] sm:$0xff] }
 0x117   :  { %v146_v48 = vmul.f32 %v825_v35, %v143_v47  ;;  %v51_v35 = vld [vmem:[#allocation2 + $0x88] sm:$0xff] }
 0x118   :  { %v55_v47 = vld [vmem:[#allocation2 + $0xa8] sm:$0xff] }
 0x119   :  { %v149_v49 = vadd.f32 %v826_v40, %v146_v48 }
 0x11b   :  { %158 = vrot.lane.b32.xlu2 %v148_v44, %s931_s25  ;;  %154 = vrot.lane.b32.xlu1 %v149_v49, %s930_s24 }
 0x123   :  { %160 = vrot.lane.b32.xlu2 %v149_v49, %s931_s25 }
 0x12b   :  { %166 = vrot.lane.b32.xlu2 %v149_v49, %s929_s23 }
 0x16d   :  { %v153_v57 = vpop.permute.xlu2 %152 }
 0x16e   :  { %v170_v59 = vsel %vm92_vm0, %v148_v44, %v153_v57 }
 0x175   :  { %v159_v58 = vpop.permute.xlu2 %158 }
 0x176   :  { %v173_v62 = vsel %vm172_vm8, %v170_v59, %v159_v58 }
 0x17d   :  { %v161_v11 = vpop.permute.xlu2 %160 }
 0x185   :  { %v165_v63 = vpop.permute.xlu0 %164  ;;  %v167_v16 = vpop.permute.xlu2 %166 }
 0x186   :  { %v176_v1 = vsel %vm175_vm9, %v173_v62, %v165_v63 }
 0x187   :  { %v178_v3 = vmul.f32 %v176_v1, %v34_v60  ;;  %v179_v4 = vmul.f32 %v176_v1, %v35_v61  ;;  %v180_v8 = vmul.f32 %v176_v1, %v36_v6  ;;  %v181_v9 = vmul.f32 %v176_v1, %v37_v7  ;;  %v42_v60 = vld [vmem:[#allocation2 + $0x40] sm:$0xff]  ;;  %v43_v1 = vld [vmem:[#allocation2 + $0x48] sm:$0xff]  ;;  %v44_v6 = vld [vmem:[#allocation2 + $0x50] sm:$0xff] }
 0x189   :  { %v186_v5 = vpack.c.bf16 %v179_v4, %v178_v3  ;;  %v187_v13 = vpack.c.bf16 %v181_v9, %v180_v8 }
 0x18b   :  { %246 = vmatmul.bf16.vlgmr.msra.gmra.mxu0 %v186_v5 }
 0x18d   :  { %v155_v12 = vpop.permute.xlu1 %154 }
 0x18e   :  { %v171_v14 = vsel %vm92_vm0, %v149_v49, %v155_v12 }
 0x18f   :  { %v174_v15 = vsel %vm172_vm8, %v171_v14, %v161_v11  ;;  %v45_v11 = vld [vmem:[#allocation2 + $0x58] sm:$0xff] }
 0x190   :  { %v177_v17 = vsel %vm175_vm9, %v174_v15, %v167_v16  ;;  %v46_v15 = vld [vmem:[#allocation2 + $0x60] sm:$0xff] }
 0x191   :  { %v182_v20 = vmul.f32 %v177_v17, %v38_v18  ;;  %v183_v21 = vmul.f32 %v177_v17, %v39_v19  ;;  %v184_v25 = vmul.f32 %v177_v17, %v40_v23  ;;  %v185_v26 = vmul.f32 %v177_v17, %v41_v24 }
 0x193   :  { %v188_v22 = vpack.c.bf16 %v183_v21, %v182_v20  ;;  %v189_v27 = vpack.c.bf16 %v185_v26, %v184_v25  ;;  %v48_v21 = vld [vmem:[#allocation2 + $0x70] sm:$0xff]  ;;  %v47_v26 = vld [vmem:[#allocation2 + $0x68] sm:$0xff] }
 0x19b   :  { %251 = vmatmul.bf16.gmra.mxu0 %v187_v13 }
 0x1ab   :  { %256 = vmatmul.bf16.gmra.mxu0 %v188_v22 }
 0x1bb   :  { %261 = vmatmul.bf16.gmra.mxu0 %v189_v27 }
 0x208   :  { %v247_v28 = vpop.f32.mrf.mxu0 }
 0x209   :  { %v1030_v48 = vadd.f32 %v247_v28, %v50_v46 }
 0x210   :  { %v249_v29 = vpop.f32.mrf.mxu0 }
 0x211   :  { %v1018_v37 = vadd.f32 %v249_v29, %v51_v35  ;;  %v49_v29 = vld [vmem:[#allocation2 + $0x78] sm:$0xff] }
 0x218   :  { %v252_v30 = vpop.f32.mrf.mxu0 }
 0x219   :  { %v1033_v51 = vadd.f32 %v252_v30, %v52_v50 }
 0x220   :  { %v254_v31 = vpop.f32.mrf.mxu0 }
 0x221   :  { %v1024_v44 = vadd.f32 %v254_v31, %v53_v41 }
 0x228   :  { %v257_v33 = vpop.f32.mrf.mxu0 }
 0x229   :  { %v1015_v34 = vadd.f32 %v257_v33, %v54_v32  ;;  %v820_v33 = vpack.i.bf16 %v1030_v48, %v1018_v37 }
 0x22b   :  { %283 = vrot.lane.b32.xlu1 %v1015_v34, %s932_s13 }
 0x230   :  { %v259_v36 = vpop.f32.mrf.mxu0 }
 0x231   :  { %v260_v49 = vadd.f32 %v259_v36, %v55_v47 }
 0x233   :  { %277 = vrot.lane.b32.xlu1 %v1018_v37, %s932_s13  ;;  %v810_v19 = vpack.i.bf16 %v1015_v34, %v260_v49 }
 0x238   :  { %v262_v39 = vpop.f32.mrf.mxu0 }
 0x239   :  { %v1021_v40 = vadd.f32 %v262_v39, %v56_v38 }
 0x23b   :  { %287 = vrot.lane.b32.xlu0 %v1021_v40, %s932_s13 }
 0x240   :  { %v264_v43 = vpop.f32.mrf.mxu0 }
 0x241   :  { %v1026_v45 = vadd.f32 %v264_v43, %v57_v42 }
 0x243   :  { %289 = vrot.lane.b32.xlu2 %v1026_v45, %s932_s13  ;;  %281 = vrot.lane.b32.xlu0 %v1024_v44, %s932_s13  ;;  %v805_v24 = vpack.i.bf16 %v1021_v40, %v1026_v45 }
 0x24b   :  { %285 = vrot.lane.b32.xlu2 %v260_v49, %s932_s13  ;;  %275 = vrot.lane.b32.xlu0 %v1030_v48, %s932_s13 }
 0x253   :  { %279 = vrot.lane.b32.xlu2 %v1033_v51, %s932_s13 }
 0x29d   :  { %v290_v52 = vpop.permute.xlu2 %289  ;;  %v284_v55 = vpop.permute.xlu1 %283 }
 0x29e   :  { %731 = vmatpush.xpose.msk.msra.mxu1 %vm291_vm10, %v290_v52 }
 0x2a5   :  { %v286_v54 = vpop.permute.xlu2 %285  ;;  %v278_v58 = vpop.permute.xlu1 %277 }
 0x2ad   :  { %v288_v53 = vpop.permute.xlu0 %287  ;;  %v280_v57 = vpop.permute.xlu2 %279 }
 0x2ae   :  { %732 = vmatpush.xpose.msk.msra.mxu1 %vm291_vm10, %v288_v53 }
 0x2b2   :  { %733 = vmatpush.xpose.msk.msra.mxu1 %vm291_vm10, %v286_v54 }
 0x2b5   :  { %v282_v56 = vpop.permute.xlu0 %281 }
 0x2b6   :  { %734 = vmatpush.xpose.msk.msra.mxu1 %vm291_vm10, %v284_v55 }
 0x2ba   :  { %735 = vmatpush.xpose.msk.msra.mxu1 %vm291_vm10, %v282_v56 }
 0x2bd   :  { %v276_v59 = vpop.permute.xlu0 %275 }
 0x2be   :  { %736 = vmatpush.xpose.msk.msra.mxu1 %vm291_vm10, %v280_v57 }
 0x2c2   :  { %737 = vmatpush.xpose.msk.msra.mxu1 %vm291_vm10, %v278_v58 }
 0x2c6   :  { %738 = vmatpush.xpose.msk.msra.mxu1 %vm291_vm10, %v276_v59  ;;  %v815_v59 = vpack.i.bf16 %v1033_v51, %v1024_v44 }
 0x2c9   :  { %739 = vmatmul.msk.f32.vlgmr.msra.gmra.mxu1 %vm291_vm10, %v1030_v48 }
 0x2d1   :  { %740 = vmatmul.msk.f32.gmra.mxu1 %vm291_vm10, %v1018_v37 }
 0x2d9   :  { %741 = vmatmul.msk.f32.gmra.mxu1 %vm291_vm10, %v1033_v51 }
 0x2e1   :  { %742 = vmatmul.msk.f32.gmra.mxu1 %vm291_vm10, %v1024_v44 }
 0x2e9   :  { %743 = vmatmul.msk.f32.gmra.mxu1 %vm291_vm10, %v1015_v34 }
 0x2f1   :  { %744 = vmatmul.msk.f32.gmra.mxu1 %vm291_vm10, %v260_v49 }
 0x2f9   :  { %745 = vmatmul.msk.f32.gmra.mxu1 %vm291_vm10, %v1021_v40 }
 0x301   :  { %746 = vmatmul.msk.f32.gmra.mxu1 %vm291_vm10, %v1026_v45 }
 0x346   :  { %v341_v61 = vpop.f32.mrf.mxu1 }
 0x347   :  { %v342_v62 = vadd.f32 %v341_v61, %v42_v60 }
 0x349   :  { %v365_v63 = vsel %vm172_vm8, %v342_v62, -inf }
 0x34a   :  { %366 = vmax.xlane.f32.xlu2 %v365_v63 }
 0x34e   :  { %v344_v3 = vpop.f32.mrf.mxu1 }
 0x34f   :  { %v345_v4 = vadd.f32 %v344_v3, %v43_v1 }
 0x351   :  { %v368_v5 = vsel %vm172_vm8, %v345_v4, -inf }
 0x352   :  { %369 = vmax.xlane.f32.xlu1 %v368_v5 }
 0x356   :  { %v347_v7 = vpop.f32.mrf.mxu1 }
 0x357   :  { %v1061_v8 = vadd.f32 %v347_v7, %v44_v6 }
 0x359   :  { %v371_v9 = vsel %vm172_vm8, %v1061_v8, -inf }
 0x35a   :  { %372 = vmax.xlane.f32.xlu0 %v371_v9 }
 0x35e   :  { %v350_v12 = vpop.f32.mrf.mxu1 }
 0x35f   :  { %v351_v13 = vadd.f32 %v350_v12, %v45_v11 }
 0x361   :  { %v374_v14 = vsel %vm172_vm8, %v351_v13, -inf }
 0x362   :  { %375 = vmax.xlane.f32.xlu2 %v374_v14 }
 0x366   :  { %v353_v16 = vpop.f32.mrf.mxu1 }
 0x367   :  { %v354_v17 = vadd.f32 %v353_v16, %v46_v15 }
 0x369   :  { %v377_v18 = vsel %vm172_vm8, %v354_v17, -inf }
 0x36a   :  { %378 = vmax.xlane.f32.xlu1 %v377_v18 }
 0x36e   :  { %v356_v20 = vpop.f32.mrf.mxu1  ;;  %811 = vrot.lane.b32.xlu0 %v810_v19, %s933_s14 }
 0x36f   :  { %v1073_v27 = vadd.f32 %v356_v20, %v47_v26 }
 0x371   :  { %v380_v28 = vsel %vm172_vm8, %v1073_v27, -inf }
 0x376   :  { %v359_v22 = vpop.f32.mrf.mxu1 }
 0x377   :  { %v360_v23 = vadd.f32 %v359_v22, %v48_v21 }
 0x379   :  { %v383_v25 = vsel %vm172_vm8, %v360_v23, -inf }
 0x37a   :  { %384 = vmax.xlane.f32.xlu1 %v383_v25  ;;  %806 = vrot.lane.b32.xlu2 %v805_v24, %s933_s14 }
 0x37e   :  { %v362_v30 = vpop.f32.mrf.mxu1 }
 0x37f   :  { %v1077_v31 = vadd.f32 %v362_v30, %v49_v29 }
 0x381   :  { %v386_v32 = vsel %vm172_vm8, %v1077_v31, -inf }
 0x398   :  { %381 = vmax.xlane.f32.xlu0 %v380_v28 }
 0x3a3   :  { %387 = vmax.xlane.f32.xlu2 %v386_v32 }
 0x3ac   :  { %821 = vrot.lane.b32.xlu0 %v820_v33, %s933_s14 }
 0x3bd   :  { %v367_v34 = vpop.xlane.xlu2 %366 }
 0x3be   :  { %v389_v35 = vsub.f32 %v342_v62, %v367_v34 }
 0x3c0   :  { %v397_v36 = vmul.f32 1.442695, %v389_v35 }
 0x3c2   :  { %837 = vpow2.f32 %v397_v36 }
 0x3c5   :  { %v370_v38 = vpop.xlane.xlu1 %369 }
 0x3c6   :  { %v390_v39 = vsub.f32 %v345_v4, %v370_v38 }
 0x3c8   :  { %v1084_v40 = vpop.eup %837  ;;  %v399_v41 = vmul.f32 1.442695, %v390_v39 }
 0x3c9   :  { %v413_v42 = vsel %vm172_vm8, %v1084_v40, 0.0 }
 0x3ca   :  { %414 = vadd.xlane.f32.xlu1 %v413_v42  ;;  %839 = vpow2.f32 %v399_v41 }
 0x3cd   :  { %v373_v47 = vpop.xlane.xlu0 %372 }
 0x3ce   :  { %v391_v5 = vsub.f32 %v1061_v8, %v373_v47 }
 0x3d0   :  { %v1088_v43 = vpop.eup %839  ;;  %v401_v6 = vmul.f32 1.442695, %v391_v5 }
 0x3d1   :  { %v416_v37 = vsel %vm172_vm8, %v1088_v43, 0.0 }
 0x3d5   :  { %v376_v45 = vpop.xlane.xlu2 %375 }
 0x3d6   :  { %v392_v46 = vsub.f32 %v351_v13, %v376_v45  ;;  %417 = vadd.xlane.f32.xlu0 %v416_v37 }
 0x3d8   :  { %v403_v48 = vmul.f32 1.442695, %v392_v46 }
 0x3da   :  { %841 = vpow2.f32 %v403_v48 }
 0x3dd   :  { %v379_v49 = vpop.xlane.xlu1 %378  ;;  %v807_v50 = vpop.permute.xlu2 %806 }
 0x3de   :  { %v393_v52 = vsub.f32 %v354_v17, %v379_v49  ;;  %v808_v53 = vunpack.i.l.bf16 %v807_v50  ;;  %v809_v57 = vunpack.i.h.bf16 %v807_v50 }
 0x3e0   :  { %v1092_v54 = vpop.eup %841  ;;  %v405_v55 = vmul.f32 1.442695, %v393_v52  ;;  %v812_v56 = vpop.permute.xlu0 %811  ;;  %509 = vmatpush.msra.mxu2 %v808_v53 }
 0x3e1   :  { %v422_v58 = vsel %vm172_vm8, %v1092_v54, 0.0  ;;  %v813_v60 = vunpack.i.l.bf16 %v812_v56  ;;  %v814_v61 = vunpack.i.h.bf16 %v812_v56 }
 0x3e2   :  { %843 = vpow2.f32 %v405_v55  ;;  %423 = vadd.xlane.f32.xlu2 %v422_v58  ;;  %510 = vmatpush.msra.mxu2 %v809_v57 }
 0x3e3   :  { %816 = vrot.lane.b32.xlu1 %v815_v59, %s933_s14 }
 0x3e4   :  { %511 = vmatpush.msra.mxu2 %v813_v60 }
 0x3e6   :  { %512 = vmatpush.msra.mxu2 %v814_v61 }
 0x3e8   :  { %v1099_v62 = vpop.eup %843 }
 0x3e9   :  { %v425_v63 = vsel %vm172_vm8, %v1099_v62, 0.0 }
 0x3ea   :  { %426 = vadd.xlane.f32.xlu2 %v425_v63 }
 0x3ed   :  { %v385_v1 = vpop.xlane.xlu1 %384 }
 0x3ee   :  { %v395_v3 = vsub.f32 %v360_v23, %v385_v1 }
 0x3f0   :  { %v409_v4 = vmul.f32 1.442695, %v395_v3 }
 0x3f2   :  { %845 = vpow2.f32 %v409_v4 }
 0x3f3   :  { %847 = vpow2.f32 %v401_v6 }
 0x3f8   :  { %v1103_v44 = vpop.eup %845 }
 0x3f9   :  { %v431_v51 = vsel %vm172_vm8, %v1103_v44, 0.0  ;;  %v848_v7 = vpop.eup %847 }
 0x3fa   :  { %432 = vadd.xlane.f32.xlu2 %v431_v51  ;;  %v419_v12 = vsel %vm172_vm8, %v848_v7, 0.0 }
 0x40b   :  { %v382_v9 = vpop.xlane.xlu0 %381 }
 0x40c   :  { %v394_v11 = vsub.f32 %v1073_v27, %v382_v9 }
 0x40d   :  { %420 = vadd.xlane.f32.xlu1 %v419_v12 }
 0x40e   :  { %v407_v13 = vmul.f32 1.442695, %v394_v11 }
 0x410   :  { %849 = vpow2.f32 %v407_v13 }
 0x416   :  { %v850_v14 = vpop.eup %849  ;;  %v388_v15 = vpop.xlane.xlu2 %387 }
 0x417   :  { %v396_v16 = vsub.f32 %v1077_v31, %v388_v15  ;;  %v428_v17 = vsel %vm172_vm8, %v850_v14, 0.0 }
 0x418   :  { %429 = vadd.xlane.f32.xlu0 %v428_v17 }
 0x419   :  { %v411_v18 = vmul.f32 1.442695, %v396_v16 }
 0x41b   :  { %851 = vpow2.f32 %v411_v18 }
 0x41e   :  { %v822_v21 = vpop.permute.xlu0 %821 }
 0x41f   :  { %v823_v27 = vunpack.i.l.bf16 %v822_v21  ;;  %v824_v28 = vunpack.i.h.bf16 %v822_v21 }
 0x421   :  { %v852_v8 = vpop.eup %851 }
 0x422   :  { %v434_v19 = vsel %vm172_vm8, %v852_v8, 0.0 }
 0x423   :  { %435 = vadd.xlane.f32.xlu0 %v434_v19  ;;  %v789_v19 = vld [vmem:[%s1176_s2 + $0x40] sm:$0xff] }
 0x43d   :  { %v415_v20 = vpop.xlane.xlu1 %414 }
 0x43e   :  { %853 = vrcp.f32 %v415_v20 }
 0x444   :  { %v854_v26 = vpop.eup %853 }
 0x445   :  { %v445_v29 = vmul.f32 %v854_v26, %v1084_v40 }
 0x449   :  { %v418_v25 = vpop.xlane.xlu0 %417 }
 0x44a   :  { %855 = vrcp.f32 %v418_v25 }
 0x450   :  { %v856_v30 = vpop.eup %855 }
 0x451   :  { %v446_v31 = vmul.f32 %v856_v30, %v1088_v43 }
 0x455   :  { %v817_v22 = vpop.permute.xlu1 %816  ;;  %v424_v33 = vpop.xlane.xlu2 %423 }
 0x456   :  { %v818_v23 = vunpack.i.l.bf16 %v817_v22  ;;  %v819_v24 = vunpack.i.h.bf16 %v817_v22  ;;  %v794_v22 = vld [vmem:[%s1176_s2 + $0x68] sm:$0xff] }
 0x458   :  { %513 = vmatpush.msra.mxu2 %v818_v23 }
 0x45a   :  { %514 = vmatpush.msra.mxu2 %v819_v24 }
 0x45c   :  { %515 = vmatpush.msra.mxu2 %v823_v27 }
 0x45d   :  { %v427_v36 = vpop.xlane.xlu2 %426 }
 0x45e   :  { %516 = vmatpush.msra.mxu2 %v824_v28 }
 0x45f   :  { %747 = vmatmul.msk.f32.vlgmr.msra.gmra.mxu2 %vm172_vm8, %v445_v29 }
 0x467   :  { %748 = vmatmul.msk.f32.gmra.mxu2 %vm172_vm8, %v446_v31 }
 0x46d   :  { %v433_v43 = vpop.xlane.xlu2 %432 }
 0x480   :  { %v421_v32 = vpop.xlane.xlu1 %420 }
 0x481   :  { %857 = vrcp.f32 %v421_v32 }
 0x482   :  { %859 = vrcp.f32 %v424_v33 }
 0x483   :  { %861 = vrcp.f32 %v427_v36 }
 0x487   :  { %v858_v34 = vpop.eup %857 }
 0x488   :  { %v447_v35 = vmul.f32 %v858_v34, %v848_v7  ;;  %v860_v38 = vpop.eup %859 }
 0x489   :  { %v448_v39 = vmul.f32 %v860_v38, %v1092_v54  ;;  %v862_v41 = vpop.eup %861  ;;  %v827_v38 = vld [vmem:[#allocation2 + $0xd0] ss:$0 sm:$0xff] }
 0x48a   :  { %749 = vmatmul.msk.f32.gmra.mxu2 %vm172_vm8, %v447_v35  ;;  %v449_v42 = vmul.f32 %v862_v41, %v1099_v62 }
 0x48b   :  { %v430_v40 = vpop.xlane.xlu0 %429 }
 0x48c   :  { %863 = vrcp.f32 %v430_v40 }
 0x48d   :  { %865 = vrcp.f32 %v433_v43 }
 0x492   :  { %750 = vmatmul.msk.f32.gmra.mxu2 %vm172_vm8, %v448_v39  ;;  %v864_v45 = vpop.eup %863 }
 0x493   :  { %v450_v37 = vmul.f32 %v864_v45, %v850_v14  ;;  %v866_v47 = vpop.eup %865 }
 0x494   :  { %v451_v48 = vmul.f32 %v866_v47, %v1103_v44  ;;  %v793_v47 = vld [vmem:[%s1176_s2 + $0x60] sm:$0xff] }
 0x496   :  { %v436_v46 = vpop.xlane.xlu0 %435 }
 0x497   :  { %867 = vrcp.f32 %v436_v46 }
 0x49a   :  { %751 = vmatmul.msk.f32.gmra.mxu2 %vm172_vm8, %v449_v42  ;;  %v828_v42 = vld [vmem:[#allocation2 + $0xd8] ss:$0 sm:$0xff] }
 0x49d   :  { %v868_v49 = vpop.eup %867 }
 0x49e   :  { %v452_v50 = vmul.f32 %v868_v49, %v852_v8  ;;  %v790_v8 = vld [vmem:[%s1176_s2 + $0x48] sm:$0xff]  ;;  %v791_v49 = vld [vmem:[%s1176_s2 + $0x50] sm:$0xff] }
 0x49f   :  { %623 = vmatpush.bf16.msra.mxu3 %v790_v8 }
 0x4a2   :  { %752 = vmatmul.msk.f32.gmra.mxu2 %vm172_vm8, %v450_v37 }
 0x4a3   :  { %624 = vmatpush.bf16.msra.mxu3 %v789_v19 }
 0x4a7   :  { %666 = vmatpush.bf16.msrb.mxu3 %v794_v22 }
 0x4aa   :  { %753 = vmatmul.msk.f32.gmra.mxu2 %vm172_vm8, %v451_v48  ;;  %v792_v48 = vld [vmem:[%s1176_s2 + $0x58] sm:$0xff]  ;;  %s934_s2 = smov [#allocation5]  }
 0x4ab   :  { %667 = vmatpush.bf16.msrb.mxu3 %v793_v47  ;;  %s684_s27 = sshll.u32 %s934_s2, 4  ;;  %s685_s27 = int_to_ptr.vmem [resolvable:$true] %s684_s27 }
 0x4af   :  { %668 = vmatpush.bf16.msrb.mxu3 %v792_v48 }
 0x4b2   :  { %754 = vmatmul.msk.f32.gmra.mxu2 %vm172_vm8, %v452_v50 }
 0x4b3   :  { %669 = vmatpush.bf16.msrb.mxu3 %v791_v49 }
 0x4e2   :  { %v518_v52 = vpop.f32.mrf.mxu2 }
 0x4ea   :  { %v521_v53 = vpop.f32.mrf.mxu2 }
 0x4eb   :  { %v542_v55 = vadd.f32 %v521_v53, %v518_v52  ;;  %v829_v52 = vld [vmem:[#allocation2 + $0xe0] ss:$0 sm:$0xff] }
 0x50d   :  { %v524_v54 = vpop.f32.mrf.mxu2 }
 0x50e   :  { %v543_v56 = vadd.f32 %v542_v55, %v524_v54 }
 0x515   :  { %v527_v57 = vpop.f32.mrf.mxu2 }
 0x516   :  { %v544_v58 = vadd.f32 %v543_v56, %v527_v57 }
 0x518   :  { %v1127_v59 = vadd.f32 %v544_v58, %v964_v0 }
 0x51a   :  { %v550_v60 = vsel %vm92_vm0, %v1127_v59, 0.0 }
 0x51b   :  { %551 = vadd.xlane.f32.xlu1 %v550_v60  ;;  %v830_v60 = vld [vmem:[#allocation2 + $0xe8] ss:$0 sm:$0xff] }
 0x51d   :  { %v530_v61 = vpop.f32.mrf.mxu2 }
 0x525   :  { %v533_v62 = vpop.f32.mrf.mxu2 }
 0x526   :  { %v545_v1 = vadd.f32 %v533_v62, %v530_v61 }
 0x52d   :  { %v536_v63 = vpop.f32.mrf.mxu2 }
 0x52e   :  { %v546_v3 = vadd.f32 %v545_v1, %v536_v63 }
 0x535   :  { %v539_v4 = vpop.f32.mrf.mxu2 }
 0x536   :  { %v547_v44 = vadd.f32 %v546_v3, %v539_v4 }
 0x538   :  { %v1132_v51 = vadd.f32 %v547_v44, %v971_v2 }
 0x53a   :  { %v553_v5 = vsel %vm92_vm0, %v1132_v51, 0.0 }
 0x53b   :  { %554 = vadd.xlane.f32.xlu2 %v553_v5 }
 0x58e   :  { %v552_v0 = vpop.xlane.xlu1 %551 }
 0x58f   :  { %v556_v6 = vmul.f32 %v552_v0, %v975_v10 }
 0x591   :  { %v558_v7 = vsub.f32 %v1127_v59, %v556_v6 }
 0x593   :  { %v560_v9 = vmul.f32 %v558_v7, %v558_v7 }
 0x595   :  { %v562_v11 = vsel %vm92_vm0, %v560_v9, 0.0 }
 0x596   :  { %563 = vadd.xlane.f32.xlu0 %v562_v11 }
 0x5ae   :  { %v555_v12 = vpop.xlane.xlu2 %554 }
 0x5af   :  { %v557_v13 = vmul.f32 %v555_v12, %v975_v10 }
 0x5b1   :  { %v559_v14 = vsub.f32 %v1132_v51, %v557_v13 }
 0x5b3   :  { %v561_v2 = vmul.f32 %v559_v14, %v559_v14 }
 0x5b5   :  { %v565_v15 = vsel %vm92_vm0, %v561_v2, 0.0 }
 0x5b6   :  { %566 = vadd.xlane.f32.xlu1 %v565_v15 }
 0x609   :  { %v564_v16 = vpop.xlane.xlu0 %563 }
 0x60a   :  { %v568_v17 = vmul.f32 %v564_v16, %v975_v10 }
 0x60c   :  { %v570_v18 = vadd.f32 1e-05, %v568_v17 }
 0x60e   :  { %869 = vrsqrt.f32 %v570_v18  ;;  %vm578_vm12 = vweird.f32 %v570_v18 }
 0x614   :  { %v870_v20 = vpop.eup %869 }
 0x615   :  { %v573_v21 = vmul.f32 %v870_v20, %v570_v18  ;;  %vm579_vm11 = vweird.f32 %v870_v20 }
 0x616   :  { %vm580_vm13 = vmor %vm578_vm12, %vm579_vm11 }
 0x617   :  { %v574_v23 = vmul.f32 %v870_v20, %v573_v21 }
 0x619   :  { %v575_v27 = vmul.f32 0.5, %v574_v23 }
 0x61b   :  { %v576_v28 = vsub.f32 1.5, %v575_v27 }
 0x61d   :  { %v577_v30 = vmul.f32 %v870_v20, %v576_v28 }
 0x61f   :  { %v581_v33 = vsel %vm580_vm13, %v870_v20, %v577_v30 }
 0x620   :  { %v592_v36 = vmul.f32 %v581_v33, %v558_v7 }
 0x622   :  { %v595_v41 = vmul.f32 %v827_v38, %v592_v36 }
 0x624   :  { %v598_v45 = vadd.f32 %v828_v42, %v595_v41 }
 0x629   :  { %v567_v24 = vpop.xlane.xlu1 %566 }
 0x62a   :  { %v569_v25 = vmul.f32 %v567_v24, %v975_v10 }
 0x62c   :  { %v571_v26 = vadd.f32 1e-05, %v569_v25 }
 0x62e   :  { %871 = vrsqrt.f32 %v571_v26  ;;  %vm588_vm15 = vweird.f32 %v571_v26 }
 0x634   :  { %v872_v29 = vpop.eup %871 }
 0x635   :  { %v583_v31 = vmul.f32 %v872_v29, %v571_v26  ;;  %vm589_vm14 = vweird.f32 %v872_v29 }
 0x636   :  { %vm590_vm1 = vmor %vm588_vm15, %vm589_vm14 }
 0x637   :  { %v584_v32 = vmul.f32 %v872_v29, %v583_v31 }
 0x639   :  { %v585_v34 = vmul.f32 0.5, %v584_v32 }
 0x63b   :  { %v586_v35 = vsub.f32 1.5, %v585_v34 }
 0x63d   :  { %v587_v39 = vmul.f32 %v872_v29, %v586_v35 }
 0x63f   :  { %v591_v10 = vsel %vm590_vm1, %v872_v29, %v587_v39 }
 0x640   :  { %v593_v40 = vmul.f32 %v591_v10, %v559_v14 }
 0x642   :  { %v596_v43 = vmul.f32 %v827_v38, %v593_v40 }
 0x644   :  { %v599_v37 = vadd.f32 %v828_v42, %v596_v43 }
 0x646   :  { %v600_v46 = vpack.c.bf16 %v599_v37, %v598_v45 }
 0x648   :  { %763 = vmatmul.msk.bf16.vlgmr.msra.gmra.mxu3 %vm92_vm0, %v600_v46 }
 0x6cb   :  { %v626_v50 = vpop.f32.mrf.mxu3 }
 0x6cc   :  { %v627_v53 = vadd.f32 %v829_v52, %v626_v50 }
 0x6ce   :  { %v631_v56 = vmax.f32 %v627_v53, 0.0 }
 0x6d3   :  { %v628_v54 = vpop.f32.mrf.mxu3 }
 0x6d4   :  { %v629_v55 = vadd.f32 %v829_v52, %v628_v54 }
 0x6d6   :  { %v632_v57 = vmax.f32 %v629_v55, 0.0 }
 0x6d8   :  { %v633_v58 = vpack.c.bf16 %v632_v57, %v631_v56 }
 0x6da   :  { %780 = vmatmul.msk.bf16.vlgmr.msrb.gmra.mxu3 %vm172_vm8, %v633_v58 }
 0x75d   :  { %v671_v61 = vpop.f32.mrf.mxu3 }
 0x75e   :  { %v672_v62 = vadd.f32 %v830_v60, %v671_v61 }
 0x760   :  { %v676_v63 = vadd.f32 %v672_v62, %v1127_v59 }
 0x762   :  { %678 = vst.msk [vmem:[#allocation5] sm:$0xff] %vm92_vm0, %v676_v63 }
 0x765   :  { %v673_v1 = vpop.f32.mrf.mxu3 }
 0x766   :  { %v674_v3 = vadd.f32 %v830_v60, %v673_v1 }
 0x768   :  { %v677_v4 = vadd.f32 %v674_v3, %v1132_v51 }
 0x76a   :  { %679 = vst.msk [vmem:[#allocation5 + $0x8] sm:$0xff] %vm92_vm0, %v677_v4 }
 0x76b   :  { %692 = dma.vmem_to_hbm [thread:$0]  %s685_s27, 256, %s687_s30, [#allocation4], %s926_s17, %s926_s17, %s927_s18  }
 0x76c   :  { %923 = dma.done.wait [#allocation4], 256  }
 0x76d   :  { %924 = vsyncadd [#allocation4], 4294967040 }
 0x76e   :  { %697 = vsyncpa [#allocation3], 1 }
 0x76f   :  { %698 = vsyncpa [#allocation4], 1 }

</bundles_post_ra>
